<compile_context>
chip_gen: v6e
topology: v6e:2x2x1
jax: 0.10.0
libtpu: 0.0.40
codegen_flags: <defaults>
</compile_context>

<pallas_src>
import numpy as np
import jax
import jax.numpy as jnp
from jax.experimental import pallas as pl
from jax.experimental.pallas import tpu as pltpu


# e3nn 1o component order: index 0 -> y, 1 -> z, 2 -> x.
_INV_SQRT3 = 0.5773502691896258   # 1/sqrt(3)
_INV_SQRT2 = 0.7071067811865476   # 1/sqrt(2)
_INV_SQRT6 = 0.4082482904638631   # 1/sqrt(6)


def _change_of_basis_ij_sym_1o() -> jnp.ndarray:
    """change_of_basis (Z=6, Di=3, Dj=3) for ReducedTensorProducts('ij=ji', i='1o').

    Row 0      : 0e  (trace part),              sum of squares = 1 = dim(0e)
    Rows 1..5  : 2e  (xy, yz, 2z^2-x^2-y^2, zx, x^2-y^2), sum of squares = 5 = dim(2e)
    Used only as the pure-JAX reference; the kernel bakes these constants in.
    """
    Y, Zi, X = 0, 1, 2
    C = np.zeros((6, 3, 3), dtype=np.float32)
    C[0] = np.eye(3, dtype=np.float32) * _INV_SQRT3                # 0e
    C[1, X, Y] = C[1, Y, X] = _INV_SQRT2                           # 2e : xy
    C[2, Y, Zi] = C[2, Zi, Y] = _INV_SQRT2                         # 2e : yz
    C[3, Zi, Zi] = 2.0 * _INV_SQRT6                                # 2e : 2z^2-x^2-y^2
    C[3, X, X] = -_INV_SQRT6
    C[3, Y, Y] = -_INV_SQRT6
    C[4, Zi, X] = C[4, X, Zi] = _INV_SQRT2                         # 2e : zx
    C[5, X, X] = _INV_SQRT2                                        # 2e : x^2-y^2
    C[5, Y, Y] = -_INV_SQRT2
    return jnp.asarray(C)


def _rtp_kernel(x_ref, y_ref, o_ref):
    # Feature-major tiles: x_ref, y_ref: (3, tb); o_ref: (6, tb).
    # All arithmetic is full-128-lane f32 VPU FMAs; no MXU, no weight operand.
    x = x_ref[...].astype(jnp.float32)
    y = y_ref[...].astype(jnp.float32)
    x0, x1, x2 = x[0:1, :], x[1:2, :], x[2:3, :]   # (1, tb) rows: y, z, x components
    y0, y1, y2 = y[0:1, :], y[1:2, :], y[2:3, :]

    d0 = x0 * y0                    # y*y
    d1 = x1 * y1                    # z*z
    d2 = x2 * y2                    # x*x
    s01 = x0 * y1 + x1 * y0         # symmetric y,z cross term
    s12 = x1 * y2 + x2 * y1         # symmetric z,x cross term
    s20 = x2 * y0 + x0 * y2         # symmetric x,y cross term

    o0 = (d0 + d1 + d2) * _INV_SQRT3            # 0e  : trace
    o1 = s20 * _INV_SQRT2                       # 2e  : xy
    o2 = s01 * _INV_SQRT2                       # 2e  : yz
    o3 = (2.0 * d1 - d0 - d2) * _INV_SQRT6      # 2e  : 2z^2 - x^2 - y^2
    o4 = s12 * _INV_SQRT2                       # 2e  : zx
    o5 = (d2 - d0) * _INV_SQRT2                 # 2e  : x^2 - y^2

    out = jnp.concatenate([o0, o1, o2, o3, o4, o5], axis=0)   # (6, tb)
    o_ref[...] = out.astype(o_ref.dtype)


def _round_up(n: int, m: int) -> int:
    return ((n + m - 1) // m) * m


def reduced_tensor_products(x: jnp.ndarray, y: jnp.ndarray, *, tb: int = 1024):
    """Forward pass of ReducedTensorProducts('ij=ji', i='1o').

    out[..., z] = sum_ij C[z, i, j] x[..., i] y[..., j]   with C baked into the kernel.
    Accepts x, y of shape (..., 3); returns (..., 6).
    """
    assert x.shape[-1] == 3 and y.shape[-1] == 3, "irreps_in = [1o, 1o] -> feature dim 3"
    assert x.shape == y.shape

    lead = x.shape[:-1]
    B = int(np.prod(lead)) if lead else 1
    Di, Dj, Z = 3, 3, 6

    # Layout plumbing (outside the kernel): feature-major so batch is lane-dense.
    xt = jnp.transpose(jnp.reshape(x, (B, Di)))   # (Di, B)
    yt = jnp.transpose(jnp.reshape(y, (B, Dj)))   # (Dj, B)

    # Tile sizing: multiple of 128 lanes, big enough to amortize per-step
    # overhead, capped so large batches still give >= 2 grid steps (v7x megacore).
    tb = _round_up(max(int(tb), 128), 128)
    tb_eff = max(128, min(tb, _round_up(B, 128)))
    if B >= 256:
        tb_eff = min(tb_eff, _round_up((B + 1) // 2, 128))
    num_tiles = pl.cdiv(B, tb_eff)

    out_t = pl.pallas_call(
        _rtp_kernel,
        out_shape=jax.ShapeDtypeStruct((Z, B), x.dtype),
        grid_spec=pltpu.PrefetchScalarGridSpec(
            num_scalar_prefetch=0,
            grid=(num_tiles,),
            in_specs=[
                pl.BlockSpec((Di, tb_eff), lambda b: (0, b)),
                pl.BlockSpec((Dj, tb_eff), lambda b: (0, b)),
            ],
            out_specs=pl.BlockSpec((Z, tb_eff), lambda b: (0, b)),
        ),
        compiler_params=pltpu.CompilerParams(dimension_semantics=("parallel",)),
        cost_estimate=pl.CostEstimate(
            flops=30 * B,
            transcendentals=0,
            bytes_accessed=(Di + Dj + Z) * 4 * B,
        ),
    )(xt, yt)

    out = jnp.transpose(out_t)            # (B, Z)
    return jnp.reshape(out, (*lead, Z))


if __name__ == "__main__":
    key = jax.random.PRNGKey(0)
    kx, ky = jax.random.split(key)

    C = _change_of_basis_ij_sym_1o()      # (6, 3, 3) — reference only

    # Small batched inputs (B, 3) in the e3nn 1o layout (y, z, x).
    B = 16
    x = jax.random.normal(kx, (B, 3), dtype=jnp.float32)
    y = jax.random.normal(ky, (B, 3), dtype=jnp.float32)

    out = jax.block_until_ready(reduced_tensor_products(x, y))
    assert out.shape == (B, 6) and out.dtype == jnp.float32

    # Reference: out_z = einsum('zij,bi,bj->bz', change_of_basis, x, y)
    ref = jnp.einsum('zij,bi,bj->bz', C, x, y)
    np.testing.assert_allclose(np.asarray(out), np.asarray(ref), rtol=1e-5, atol=1e-5)

    # Symmetry of the formula 'ij=ji': tp(x, y) == tp(y, x)
    out_sw = jax.block_until_ready(reduced_tensor_products(y, x))
    np.testing.assert_allclose(np.asarray(out), np.asarray(out_sw), rtol=1e-5, atol=1e-5)

    # Ragged, multi-tile batch: exercises grid > 1 and the masked final tile
    # (no jnp.pad anywhere in the wrapper).
    B2 = 300
    kx2, ky2 = jax.random.split(ky)
    x2 = jax.random.normal(kx2, (B2, 3), dtype=jnp.float32)
    y2 = jax.random.normal(ky2, (B2, 3), dtype=jnp.float32)
    out2 = jax.block_until_ready(reduced_tensor_products(x2, y2))
    ref2 = jnp.einsum('zij,bi,bj->bz', C, x2, y2)
    np.testing.assert_allclose(np.asarray(out2), np.asarray(ref2), rtol=1e-5, atol=1e-5)

    # Unbatched call, as in the e3nn docstring.
    x1 = jnp.array([1.0, 0.0, 0.0], dtype=jnp.float32)
    y1 = jnp.array([0.0, 1.0, 0.0], dtype=jnp.float32)
    o1 = jax.block_until_ready(reduced_tensor_products(x1, y1))
    r1 = jnp.einsum('zij,i,j->z', C, x1, y1)
    np.testing.assert_allclose(np.asarray(o1), np.asarray(r1), rtol=1e-5, atol=1e-5)
    assert o1.shape == (6,)

    print("KERNEL_OK")
</pallas_src>

<mosaic_0001>
module attributes {stable_mosaic.version = 11 : i64} {
  func.func @_rtp_kernel(%arg0: i32, %arg1: memref<3x128xf32, #tpu.memory_space<vmem>>, %arg2: memref<3x128xf32, #tpu.memory_space<vmem>>, %arg3: memref<6x128xf32, #tpu.memory_space<vmem>>) attributes {dimension_semantics = [#tpu.dimension_semantics<parallel>], iteration_bounds = array<i64: 1>, scalar_prefetch = 0 : i64, scratch_operands = 0 : i64, tpu.core_type = #tpu.core_type<tc>, window_params = [{transform_indices = @transform_0, window_bounds = array<i64: 3, 128>}, {transform_indices = @transform_1, window_bounds = array<i64: 3, 128>}, {transform_indices = @transform_2, window_bounds = array<i64: 6, 128>}]} {
    %c0 = arith.constant 0 : index
    %c0_0 = arith.constant 0 : index
    %0 = vector.load %arg1[%c0, %c0_0] : memref<3x128xf32, #tpu.memory_space<vmem>>, vector<3x128xf32>
    %c0_1 = arith.constant 0 : index
    %c0_2 = arith.constant 0 : index
    %1 = vector.load %arg2[%c0_1, %c0_2] : memref<3x128xf32, #tpu.memory_space<vmem>>, vector<3x128xf32>
    %2 = vector.extract_strided_slice %0 {offsets = [0, 0], sizes = [1, 128], strides = [1, 1]} : vector<3x128xf32> to vector<1x128xf32>
    %3 = vector.extract_strided_slice %0 {offsets = [1, 0], sizes = [1, 128], strides = [1, 1]} : vector<3x128xf32> to vector<1x128xf32>
    %4 = vector.extract_strided_slice %0 {offsets = [2, 0], sizes = [1, 128], strides = [1, 1]} : vector<3x128xf32> to vector<1x128xf32>
    %5 = vector.extract_strided_slice %1 {offsets = [0, 0], sizes = [1, 128], strides = [1, 1]} : vector<3x128xf32> to vector<1x128xf32>
    %6 = vector.extract_strided_slice %1 {offsets = [1, 0], sizes = [1, 128], strides = [1, 1]} : vector<3x128xf32> to vector<1x128xf32>
    %7 = vector.extract_strided_slice %1 {offsets = [2, 0], sizes = [1, 128], strides = [1, 1]} : vector<3x128xf32> to vector<1x128xf32>
    %8 = arith.mulf %2, %5 : vector<1x128xf32>
    %9 = arith.mulf %3, %6 : vector<1x128xf32>
    %10 = arith.mulf %4, %7 : vector<1x128xf32>
    %11 = arith.mulf %2, %6 : vector<1x128xf32>
    %12 = arith.mulf %3, %5 : vector<1x128xf32>
    %13 = arith.addf %11, %12 : vector<1x128xf32>
    %14 = arith.mulf %3, %7 : vector<1x128xf32>
    %15 = arith.mulf %4, %6 : vector<1x128xf32>
    %16 = arith.addf %14, %15 : vector<1x128xf32>
    %17 = arith.mulf %4, %5 : vector<1x128xf32>
    %18 = arith.mulf %2, %7 : vector<1x128xf32>
    %19 = arith.addf %17, %18 : vector<1x128xf32>
    %20 = arith.addf %8, %9 : vector<1x128xf32>
    %21 = arith.addf %20, %10 : vector<1x128xf32>
    %cst = arith.constant 0.577350259 : f32
    %22 = vector.broadcast %cst : f32 to vector<1x128xf32>
    %23 = arith.mulf %21, %22 : vector<1x128xf32>
    %cst_3 = arith.constant 0.707106769 : f32
    %24 = vector.broadcast %cst_3 : f32 to vector<1x128xf32>
    %25 = arith.mulf %19, %24 : vector<1x128xf32>
    %cst_4 = arith.constant 0.707106769 : f32
    %26 = vector.broadcast %cst_4 : f32 to vector<1x128xf32>
    %27 = arith.mulf %13, %26 : vector<1x128xf32>
    %cst_5 = arith.constant 2.000000e+00 : f32
    %28 = vector.broadcast %cst_5 : f32 to vector<1x128xf32>
    %29 = arith.mulf %28, %9 : vector<1x128xf32>
    %30 = arith.subf %29, %8 : vector<1x128xf32>
    %31 = arith.subf %30, %10 : vector<1x128xf32>
    %cst_6 = arith.constant 0.408248305 : f32
    %32 = vector.broadcast %cst_6 : f32 to vector<1x128xf32>
    %33 = arith.mulf %31, %32 : vector<1x128xf32>
    %cst_7 = arith.constant 0.707106769 : f32
    %34 = vector.broadcast %cst_7 : f32 to vector<1x128xf32>
    %35 = arith.mulf %16, %34 : vector<1x128xf32>
    %36 = arith.subf %10, %8 : vector<1x128xf32>
    %cst_8 = arith.constant 0.707106769 : f32
    %37 = vector.broadcast %cst_8 : f32 to vector<1x128xf32>
    %38 = arith.mulf %36, %37 : vector<1x128xf32>
    %39 = tpu.concatenate %23, %25, %27, %33, %35, %38 in 0 : vector<1x128xf32>, vector<1x128xf32>, vector<1x128xf32>, vector<1x128xf32>, vector<1x128xf32>, vector<1x128xf32> -> vector<6x128xf32>
    %c0_9 = arith.constant 0 : index
    %c0_10 = arith.constant 0 : index
    %40 = vector.load %arg3[%c0_9, %c0_10] : memref<6x128xf32, #tpu.memory_space<vmem>>, vector<6x128xf32>
    tpu.vector_store %arg3[%c0_9, %c0_10], %39 {strides = array<i32>} : memref<6x128xf32, #tpu.memory_space<vmem>>, vector<6x128xf32>,
    return
  }
  func.func @transform_0(%arg0: i32) -> (i32, i32) {
    %c0_i32 = arith.constant 0 : i32
    %c0_i32_0 = arith.constant 0 : i32
    return %c0_i32, %arg0 : i32, i32
  }
  func.func @transform_1(%arg0: i32) -> (i32, i32) {
    %c0_i32 = arith.constant 0 : i32
    %c0_i32_0 = arith.constant 0 : i32
    return %c0_i32, %arg0 : i32, i32
  }
  func.func @transform_2(%arg0: i32) -> (i32, i32) {
    %c0_i32 = arith.constant 0 : i32
    %c0_i32_0 = arith.constant 0 : i32
    return %c0_i32, %arg0 : i32, i32
  }
}

</mosaic_0001>

<bundles_post_ra>
// kernel: tpu_custom_call.1
= control target key start
LH: loop header
LB: loop body
LE: loop exit
PB: predicated region body
PF: predicated region fallthrough
CT: control target
= control target key end

     0   :  { %7 = vsyncpa [#allocation3], 0  ;;  %s217_s0 = inlined_call_operand.hbm [shape: f32[3,16], index: 0, kind: input, shape index: {}]   ;;  %s218_s1 = inlined_call_operand.hbm [shape: f32[3,16], index: 1, kind: input, shape index: {}]   ;;  %s219_s2 = inlined_call_operand.hbm [shape: f32[6,16], index: 2, kind: output, shape index: {}]  }
   0x1   :  { %8 = vsyncpa [#allocation6], 0 }
   0x2   :  { %9 = vsyncpa [#allocation4], 0  ;;  %s190_s9 = smov [#allocation2]   ;;  %s191_s11 = smov [#allocation5]  }
   0x3   :  { %s16_s10 = sshll.u32 %s190_s9, 4  ;;  %s26_s12 = sshll.u32 %s191_s11, 4  ;;  %s17_s10 = int_to_ptr.vmem [resolvable:$true] %s16_s10  ;;  %s27_s12 = int_to_ptr.vmem [resolvable:$true] %s26_s12 }
   0x4   :  { %s132_s13 = scalar_lea.vmem %s17_s10, 64  ;;  %p137_p1 = scmp.lt.s32.totalorder %s17_s10, %s17_s10 }
   0x5   :  { %p133_p0 = scmp.ne.s32.totalorder %s17_s10, %s132_s13  ;;  %p138_p2 = scmp.lt.s32.totalorder %s132_s13, %s132_s13 }
   0x7   :  { %p139_p3 = por %p138_p2, %p137_p1 }
   0x9   :  { %p140_p4 = pnand %p139_p3, %p133_p0 }
   0xb   :  { %143 = shalt.err (!%p140_p4)
}
   0xc   :  { %19 = dma.hbm_to_vmem [thread:$0]  %s217_s0, 64, %s17_s10, [#allocation3]  }
   0xd   :  { %s152_s16 = scalar_lea.vmem %s27_s12, 64  ;;  %p157_p6 = scmp.lt.s32.totalorder %s27_s12, %s27_s12 }
   0xe   :  { %p153_p5 = scmp.ne.s32.totalorder %s27_s12, %s152_s16  ;;  %p158_p7 = scmp.lt.s32.totalorder %s152_s16, %s152_s16 }
  0x10   :  { %p159_p8 = por %p158_p7, %p157_p6 }
  0x12   :  { %p160_p9 = pnand %p159_p8, %p153_p5 }
  0x14   :  { %163 = shalt.err (!%p160_p9)
}
  0x15   :  { %29 = dma.hbm_to_vmem [thread:$0]  %s218_s1, 64, %s27_s12, [#allocation6]  }
  0x16   :  { %184 = dma.done.wait [#allocation3], 64  }
  0x17   :  { %185 = vsyncadd [#allocation3], 4294967232 }
  0x18   :  { %186 = dma.done.wait [#allocation6], 64  }
  0x19   :  { %187 = vsyncadd [#allocation6], 4294967232  ;;  %v36_v0 = vld [vmem:[#allocation2] sm:$0x7]  ;;  %v37_v1 = vld [vmem:[#allocation5] sm:$0x7] }
  0x1a   :  { %v38_v2 = vmul.f32 %v37_v1, %v36_v0  ;;  %v40_v3 = vrot.slane %v37_v1, 1  ;;  %v43_v4 = vrot.slane %v37_v1, 7  ;;  %v50_v5 = vrot.slane %v37_v1, 6  ;;  %s192_s0 = smov [#allocation7]  }
  0x1b   :  { %v53_v6 = vrot.slane %v37_v1, 2  ;;  %vm94_vm0 = vcmask 1040384   ;;  %vm96_vm1 = vcmask 1041408   ;;  %vm98_vm2 = vcmask 1042432   ;;  %s111_s1 = sshll.u32 %s192_s0, 4  ;;  %s112_s1 = int_to_ptr.vmem [resolvable:$true] %s111_s1 }
  0x1c   :  { %v42_v7 = vmul.f32 %v40_v3, %v36_v0  ;;  %v45_v8 = vmul.f32 %v43_v4, %v36_v0  ;;  %v52_v9 = vmul.f32 %v50_v5, %v36_v0  ;;  %v61_v10 = vrot.slane %v38_v2, 1  ;;  %s164_s19 = scalar_lea.vmem %s112_s1, 128  ;;  %p169_p11 = scmp.lt.s32.totalorder %s112_s1, %s112_s1 }
  0x1d   :  { %v55_v11 = vmul.f32 %v53_v6, %v36_v0  ;;  %v64_v12 = vrot.slane %v38_v2, 2  ;;  %v70_v13 = vmul.f32 2.0, %v38_v2  ;;  %v71_v14 = vrot.slane %v38_v2, 7  ;;  %p165_p10 = scmp.ne.s32.totalorder %s112_s1, %s164_s19  ;;  %p170_p12 = scmp.lt.s32.totalorder %s164_s19, %s164_s19 }
  0x1e   :  { %v47_v15 = vrot.slane %v45_v8, 1  ;;  %v63_v16 = vadd.f32 %v61_v10, %v38_v2  ;;  %v76_v17 = vrot.slane %v38_v2, 6  ;;  %vm100_vm3 = vcmask 1043456  }
  0x1f   :  { %v57_v18 = vrot.slane %v55_v11, 6  ;;  %v73_v19 = vsub.f32 %v70_v13, %v71_v14  ;;  %vm102_vm4 = vcmask 1044480   ;;  %p171_p13 = por %p170_p12, %p169_p11 }
  0x20   :  { %v49_v20 = vadd.f32 %v47_v15, %v42_v7  ;;  %v66_v21 = vadd.f32 %v64_v12, %v63_v16  ;;  %v78_v22 = vsub.f32 %v38_v2, %v76_v17 }
  0x21   :  { %v59_v23 = vadd.f32 %v57_v18, %v52_v9  ;;  %v74_v24 = vsub.f32 %v73_v19, %v61_v10  ;;  %p172_p0 = pnand %p171_p13, %p165_p10 }
  0x22   :  { %v67_v25 = vmul.f32 0.57735026, %v66_v21  ;;  %v69_v26 = vmul.f32 0.70710677, %v49_v20  ;;  %v79_v29 = vmul.f32 0.70710677, %v78_v22 }
  0x23   :  { %v68_v27 = vmul.f32 0.70710677, %v59_v23  ;;  %v75_v28 = vmul.f32 0.4082483, %v74_v24 }
  0x24   :  { %v84_v30 = vrot.slane %v69_v26, 6  ;;  %v89_v33 = vrot.slane %v69_v26, 5  ;;  %v92_v34 = vrot.slane %v79_v29, 5 }
  0x25   :  { %v81_v31 = vrot.slane %v68_v27, 1  ;;  %v87_v32 = vrot.slane %v75_v28, 6 }
  0x27   :  { %v95_v35 = vsel %vm94_vm0, %v67_v25, %v81_v31 }
  0x28   :  { %v97_v36 = vsel %vm96_vm1, %v95_v35, %v84_v30 }
  0x29   :  { %v99_v37 = vsel %vm98_vm2, %v97_v36, %v87_v32 }
  0x2a   :  { %v101_v38 = vsel %vm100_vm3, %v99_v37, %v89_v33 }
  0x2b   :  { %v103_v39 = vsel %vm102_vm4, %v101_v38, %v92_v34 }
  0x2c   :  { %104 = vst [vmem:[#allocation7] sm:$0x3f] %v103_v39 }
  0x2d   :  { %175 = shalt.err (!%p172_p0)
}
  0x2e   :  { %114 = dma.vmem_to_hbm [thread:$0]  %s112_s1, 128, %s219_s2, [#allocation4]  }
  0x2f   :  { %188 = dma.done.wait [#allocation4], 128  }
  0x30   :  { %189 = vsyncadd [#allocation4], 4294967168 }
  0x31   :  { %118 = vsyncpa [#allocation3], 1 }
  0x32   :  { %119 = vsyncpa [#allocation6], 1 }
  0x33   :  { %120 = vsyncpa [#allocation4], 1 }

</bundles_post_ra>
